<compile_context>
chip_gen: v7x
topology: tpu7x:2x2x1
jax: 0.10.0
libtpu: 0.0.40
codegen_flags: <defaults>
</compile_context>

<pallas_src>
import functools

import jax
import jax.numpy as jnp
from jax.experimental import pallas as pl
from jax.experimental.pallas import tpu as pltpu

N_LAYERS = 10  # 5 encoder linears + 5 decoder linears


def _layer_dims(n_traits):
    # feature sizes: in -> ... -> encoded(4) -> ... -> out
    return [n_traits, 200, 120, 60, 32, 4, 32, 60, 120, 200, n_traits]


def _round_up(x, m):
    return ((x + m - 1) // m) * m


def autoencoder_kernel(x_ref, *refs):
    """Fused forward pass for one batch tile.

    refs = (w0..w9 [bf16, lane-padded, resident],
            b0..b9 [f32 (1, out_pad), resident],
            enc_ref, dec_ref).
    """
    w_refs = refs[:N_LAYERS]
    b_refs = refs[N_LAYERS:2 * N_LAYERS]
    enc_ref = refs[2 * N_LAYERS]
    dec_ref = refs[2 * N_LAYERS + 1]

    h = x_ref[...]  # (TB, n_traits) f32

    for i in range(N_LAYERS):
        w = w_refs[i][...]          # bf16 (in_pad_i, out_pad_i)
        b = b_refs[i][...]          # f32  (1, out_pad_i)
        # MXU in bf16 with f32 accumulation; bias/ReLU stay in f32 on the VPU.
        h = jnp.dot(h.astype(jnp.bfloat16), w,
                    preferred_element_type=jnp.float32)
        h = h + b
        if i != 4 and i != 9:       # no ReLU after encoder-last / decoder-last
            h = jnp.maximum(h, 0.0)
        if i == 4:
            enc_ref[...] = h        # lane-dense unmasked store

    dec_ref[...] = h                # lane-dense unmasked store


def _prepare_params(weights, biases, n_traits):
    """Zero-pad every layer to lane-dense widths and cast weights to bf16.

    Returns (w_list bf16, b_list f32 (1, out_pad), padded_dims) where
    padded_dims[0] == n_traits (x itself is never padded) and
    padded_dims[i>0] == round_up(dims[i], 128).
    """
    dims = _layer_dims(n_traits)
    pads = [dims[0]] + [_round_up(d, 128) for d in dims[1:]]

    w_list, b_list = [], []
    for i in range(N_LAYERS):
        in_d, out_d = dims[i], dims[i + 1]
        in_p, out_p = pads[i], pads[i + 1]
        w = weights[i].astype(jnp.float32)
        b = biases[i].reshape(1, -1).astype(jnp.float32)
        # zero rows absorb the padded lanes of the previous activation;
        # zero cols + zero bias keep the padded output lanes exactly 0.
        w = jnp.pad(w, ((0, in_p - in_d), (0, out_p - out_d)))
        b = jnp.pad(b, ((0, 0), (0, out_p - out_d)))
        w_list.append(w.astype(jnp.bfloat16))
        b_list.append(b)
    return w_list, b_list, pads


def autoencoder_forward(x, weights, biases, *, tb=1024):
    """x: (B, n_traits) f32. weights[i]: (in_i, out_i) f32. biases[i]: (out_i,).

    Returns (encoded (B, 4), decoded (B, n_traits)), both f32.
    """
    B, n_traits = x.shape
    dims = _layer_dims(n_traits)

    w_list, b_list, pads = _prepare_params(weights, biases, n_traits)
    enc_pad = pads[5]    # 128 (encoded slab lane width)
    out_pad = pads[10]   # round_up(n_traits, 128)

    # --- batch tiling ---
    TB = min(tb, _round_up(B, 8))
    B_pad = pl.cdiv(B, TB) * TB
    if B_pad != B:
        x = jnp.pad(x, ((0, B_pad - B), (0, 0)))
    num_tiles = B_pad // TB

    x_spec = pl.BlockSpec((TB, n_traits), lambda i: (i, 0))

    def const_spec(shape):
        return pl.BlockSpec(shape, lambda i: (0, 0))

    in_specs = ([x_spec]
                + [const_spec(w.shape) for w in w_list]
                + [const_spec(b.shape) for b in b_list])
    out_specs = (pl.BlockSpec((TB, enc_pad), lambda i: (i, 0)),
                 pl.BlockSpec((TB, out_pad), lambda i: (i, 0)))
    out_shape = (jax.ShapeDtypeStruct((B_pad, enc_pad), jnp.float32),
                 jax.ShapeDtypeStruct((B_pad, out_pad), jnp.float32))

    flops = 2 * B_pad * sum(dims[i] * dims[i + 1] for i in range(N_LAYERS))
    bytes_accessed = (B_pad * n_traits * 4                       # x
                      + B_pad * (enc_pad + out_pad) * 4          # outputs
                      + sum(int(w.size) * 2 for w in w_list)     # bf16 weights
                      + sum(int(b.size) * 4 for b in b_list))    # f32 biases

    enc_p, dec_p = pl.pallas_call(
        autoencoder_kernel,
        grid=(num_tiles,),
        in_specs=in_specs,
        out_specs=out_specs,
        out_shape=out_shape,
        compiler_params=pltpu.CompilerParams(
            dimension_semantics=("parallel",)),
        cost_estimate=pl.CostEstimate(
            flops=flops, transcendentals=0, bytes_accessed=bytes_accessed),
    )(x, *w_list, *b_list)

    return enc_p[:B, :4], dec_p[:B, :n_traits]


def init_params(key, n_traits):
    """Deterministic init mirroring nn.Linear's U(-1/sqrt(fan_in), 1/sqrt(fan_in))."""
    dims = _layer_dims(n_traits)
    weights, biases = [], []
    for i in range(N_LAYERS):
        fan_in, fan_out = dims[i], dims[i + 1]
        key, wk, bk = jax.random.split(key, 3)
        bound = 1.0 / jnp.sqrt(jnp.float32(fan_in))
        w = jax.random.uniform(wk, (fan_in, fan_out), jnp.float32, -bound, bound)
        b = jax.random.uniform(bk, (fan_out,), jnp.float32, -bound, bound)
        weights.append(w)
        biases.append(b)
    return weights, biases


def reference_forward(x, weights, biases, *, bf16_operands=False):
    """Pure-JAX reference. If bf16_operands, mimic the kernel's MXU dtype."""
    def dot(a, w):
        if bf16_operands:
            return jnp.dot(a.astype(jnp.bfloat16), w.astype(jnp.bfloat16),
                           preferred_element_type=jnp.float32)
        return jnp.dot(a, w, preferred_element_type=jnp.float32)

    h = x
    for i in range(5):
        h = dot(h, weights[i]) + biases[i]
        if i < 4:
            h = jnp.maximum(h, 0.0)
    enc = h
    for i in range(5, 10):
        h = dot(h, weights[i]) + biases[i]
        if i < 9:
            h = jnp.maximum(h, 0.0)
    return enc, h


if __name__ == "__main__":
    n_traits = 16
    batch = 8

    key = jax.random.PRNGKey(0)
    key, xk = jax.random.split(key)
    x = jax.random.normal(xk, (batch, n_traits), dtype=jnp.float32)

    weights, biases = init_params(key, n_traits)

    fwd = jax.jit(functools.partial(autoencoder_forward, tb=1024))
    encoded, decoded = fwd(x, weights, biases)
    jax.block_until_ready((encoded, decoded))

    assert encoded.shape == (batch, 4) and decoded.shape == (batch, n_traits)

    # Tight check against a reference using the same bf16-operand matmul math.
    enc_b, dec_b = reference_forward(x, weights, biases, bf16_operands=True)
    assert jnp.allclose(encoded, enc_b, atol=1e-2, rtol=1e-2)
    assert jnp.allclose(decoded, dec_b, atol=1e-2, rtol=1e-2)

    # Looser check against the full-f32 PyTorch-equivalent forward.
    enc_f, dec_f = reference_forward(x, weights, biases, bf16_operands=False)
    assert jnp.allclose(encoded, enc_f, atol=1e-1, rtol=1e-1)
    assert jnp.allclose(decoded, dec_f, atol=1e-1, rtol=1e-1)

    print("KERNEL_OK")
</pallas_src>

<mosaic_0001>
module attributes {stable_mosaic.version = 11 : i64} {
  func.func @autoencoder_kernel(%arg0: i32, %arg1: memref<8x16xf32, #tpu.memory_space<vmem>>, %arg2: memref<16x256xbf16, #tpu.memory_space<vmem>>, %arg3: memref<256x128xbf16, #tpu.memory_space<vmem>>, %arg4: memref<128x128xbf16, #tpu.memory_space<vmem>>, %arg5: memref<128x128xbf16, #tpu.memory_space<vmem>>, %arg6: memref<128x128xbf16, #tpu.memory_space<vmem>>, %arg7: memref<128x128xbf16, #tpu.memory_space<vmem>>, %arg8: memref<128x128xbf16, #tpu.memory_space<vmem>>, %arg9: memref<128x128xbf16, #tpu.memory_space<vmem>>, %arg10: memref<128x256xbf16, #tpu.memory_space<vmem>>, %arg11: memref<256x128xbf16, #tpu.memory_space<vmem>>, %arg12: memref<1x256xf32, #tpu.memory_space<vmem>>, %arg13: memref<1x128xf32, #tpu.memory_space<vmem>>, %arg14: memref<1x128xf32, #tpu.memory_space<vmem>>, %arg15: memref<1x128xf32, #tpu.memory_space<vmem>>, %arg16: memref<1x128xf32, #tpu.memory_space<vmem>>, %arg17: memref<1x128xf32, #tpu.memory_space<vmem>>, %arg18: memref<1x128xf32, #tpu.memory_space<vmem>>, %arg19: memref<1x128xf32, #tpu.memory_space<vmem>>, %arg20: memref<1x256xf32, #tpu.memory_space<vmem>>, %arg21: memref<1x128xf32, #tpu.memory_space<vmem>>, %arg22: memref<8x128xf32, #tpu.memory_space<vmem>>, %arg23: memref<8x128xf32, #tpu.memory_space<vmem>>) attributes {dimension_semantics = [#tpu.dimension_semantics<parallel>], iteration_bounds = array<i64: 1>, scalar_prefetch = 0 : i64, scratch_operands = 0 : i64, tpu.core_type = #tpu.core_type<tc>, window_params = [{transform_indices = @transform_0, window_bounds = array<i64: 8, 16>}, {pipeline_mode = #tpu.pipeline_mode<synchronous>, transform_indices = @transform_1, window_bounds = array<i64: 16, 256>}, {pipeline_mode = #tpu.pipeline_mode<synchronous>, transform_indices = @transform_2, window_bounds = array<i64: 256, 128>}, {pipeline_mode = #tpu.pipeline_mode<synchronous>, transform_indices = @transform_3, window_bounds = array<i64: 128, 128>}, {pipeline_mode = #tpu.pipeline_mode<synchronous>, transform_indices = @transform_4, window_bounds = array<i64: 128, 128>}, {pipeline_mode = #tpu.pipeline_mode<synchronous>, transform_indices = @transform_5, window_bounds = array<i64: 128, 128>}, {pipeline_mode = #tpu.pipeline_mode<synchronous>, transform_indices = @transform_6, window_bounds = array<i64: 128, 128>}, {pipeline_mode = #tpu.pipeline_mode<synchronous>, transform_indices = @transform_7, window_bounds = array<i64: 128, 128>}, {pipeline_mode = #tpu.pipeline_mode<synchronous>, transform_indices = @transform_8, window_bounds = array<i64: 128, 128>}, {pipeline_mode = #tpu.pipeline_mode<synchronous>, transform_indices = @transform_9, window_bounds = array<i64: 128, 256>}, {pipeline_mode = #tpu.pipeline_mode<synchronous>, transform_indices = @transform_10, window_bounds = array<i64: 256, 128>}, {pipeline_mode = #tpu.pipeline_mode<synchronous>, transform_indices = @transform_11, window_bounds = array<i64: 1, 256>}, {pipeline_mode = #tpu.pipeline_mode<synchronous>, transform_indices = @transform_12, window_bounds = array<i64: 1, 128>}, {pipeline_mode = #tpu.pipeline_mode<synchronous>, transform_indices = @transform_13, window_bounds = array<i64: 1, 128>}, {pipeline_mode = #tpu.pipeline_mode<synchronous>, transform_indices = @transform_14, window_bounds = array<i64: 1, 128>}, {pipeline_mode = #tpu.pipeline_mode<synchronous>, transform_indices = @transform_15, window_bounds = array<i64: 1, 128>}, {pipeline_mode = #tpu.pipeline_mode<synchronous>, transform_indices = @transform_16, window_bounds = array<i64: 1, 128>}, {pipeline_mode = #tpu.pipeline_mode<synchronous>, transform_indices = @transform_17, window_bounds = array<i64: 1, 128>}, {pipeline_mode = #tpu.pipeline_mode<synchronous>, transform_indices = @transform_18, window_bounds = array<i64: 1, 128>}, {pipeline_mode = #tpu.pipeline_mode<synchronous>, transform_indices = @transform_19, window_bounds = array<i64: 1, 256>}, {pipeline_mode = #tpu.pipeline_mode<synchronous>, transform_indices = @transform_20, window_bounds = array<i64: 1, 128>}, {transform_indices = @transform_21, window_bounds = array<i64: 8, 128>}, {transform_indices = @transform_22, window_bounds = array<i64: 8, 128>}]} {
    %c0 = arith.constant 0 : index
    %c0_0 = arith.constant 0 : index
    %0 = vector.load %arg1[%c0, %c0_0] : memref<8x16xf32, #tpu.memory_space<vmem>>, vector<8x16xf32>
    %c0_1 = arith.constant 0 : index
    %c0_2 = arith.constant 0 : index
    %1 = vector.load %arg2[%c0_1, %c0_2] : memref<16x256xbf16, #tpu.memory_space<vmem>>, vector<16x256xbf16>
    %c0_3 = arith.constant 0 : index
    %c0_4 = arith.constant 0 : index
    %2 = vector.load %arg12[%c0_3, %c0_4] : memref<1x256xf32, #tpu.memory_space<vmem>>, vector<1x256xf32>
    %3 = arith.truncf %0 : vector<8x16xf32> to vector<8x16xbf16>
    %cst = arith.constant dense<0.000000e+00> : vector<8x256xf32>
    %4 = tpu.matmul %3, %1, %cst {dimension_numbers = #tpu.dot_dimension_numbers<[1], [0], [0], [1], [0, 0, 1, 1], [], []>} : vector<8x16xbf16>, vector<16x256xbf16>, vector<8x256xf32> -> vector<8x256xf32>
    %5 = vector.broadcast %2 : vector<1x256xf32> to vector<8x256xf32>
    %6 = arith.addf %4, %5 : vector<8x256xf32>
    %cst_5 = arith.constant 0.000000e+00 : f32
    %7 = vector.broadcast %cst_5 : f32 to vector<8x256xf32>
    %8 = arith.maximumf %6, %7 : vector<8x256xf32>
    %c0_6 = arith.constant 0 : index
    %c0_7 = arith.constant 0 : index
    %9 = vector.load %arg3[%c0_6, %c0_7] : memref<256x128xbf16, #tpu.memory_space<vmem>>, vector<256x128xbf16>
    %c0_8 = arith.constant 0 : index
    %c0_9 = arith.constant 0 : index
    %10 = vector.load %arg13[%c0_8, %c0_9] : memref<1x128xf32, #tpu.memory_space<vmem>>, vector<1x128xf32>
    %11 = arith.truncf %8 : vector<8x256xf32> to vector<8x256xbf16>
    %cst_10 = arith.constant dense<0.000000e+00> : vector<8x128xf32>
    %12 = tpu.matmul %11, %9, %cst_10 {dimension_numbers = #tpu.dot_dimension_numbers<[1], [0], [0], [1], [0, 0, 1, 1], [], []>} : vector<8x256xbf16>, vector<256x128xbf16>, vector<8x128xf32> -> vector<8x128xf32>
    %13 = vector.broadcast %10 : vector<1x128xf32> to vector<8x128xf32>
    %14 = arith.addf %12, %13 : vector<8x128xf32>
    %cst_11 = arith.constant 0.000000e+00 : f32
    %15 = vector.broadcast %cst_11 : f32 to vector<8x128xf32>
    %16 = arith.maximumf %14, %15 : vector<8x128xf32>
    %c0_12 = arith.constant 0 : index
    %c0_13 = arith.constant 0 : index
    %17 = vector.load %arg4[%c0_12, %c0_13] : memref<128x128xbf16, #tpu.memory_space<vmem>>, vector<128x128xbf16>
    %c0_14 = arith.constant 0 : index
    %c0_15 = arith.constant 0 : index
    %18 = vector.load %arg14[%c0_14, %c0_15] : memref<1x128xf32, #tpu.memory_space<vmem>>, vector<1x128xf32>
    %19 = arith.truncf %16 : vector<8x128xf32> to vector<8x128xbf16>
    %cst_16 = arith.constant dense<0.000000e+00> : vector<8x128xf32>
    %20 = tpu.matmul %19, %17, %cst_16 {dimension_numbers = #tpu.dot_dimension_numbers<[1], [0], [0], [1], [0, 0, 1, 1], [], []>} : vector<8x128xbf16>, vector<128x128xbf16>, vector<8x128xf32> -> vector<8x128xf32>
    %21 = vector.broadcast %18 : vector<1x128xf32> to vector<8x128xf32>
    %22 = arith.addf %20, %21 : vector<8x128xf32>
    %cst_17 = arith.constant 0.000000e+00 : f32
    %23 = vector.broadcast %cst_17 : f32 to vector<8x128xf32>
    %24 = arith.maximumf %22, %23 : vector<8x128xf32>
    %c0_18 = arith.constant 0 : index
    %c0_19 = arith.constant 0 : index
    %25 = vector.load %arg5[%c0_18, %c0_19] : memref<128x128xbf16, #tpu.memory_space<vmem>>, vector<128x128xbf16>
    %c0_20 = arith.constant 0 : index
    %c0_21 = arith.constant 0 : index
    %26 = vector.load %arg15[%c0_20, %c0_21] : memref<1x128xf32, #tpu.memory_space<vmem>>, vector<1x128xf32>
    %27 = arith.truncf %24 : vector<8x128xf32> to vector<8x128xbf16>
    %cst_22 = arith.constant dense<0.000000e+00> : vector<8x128xf32>
    %28 = tpu.matmul %27, %25, %cst_22 {dimension_numbers = #tpu.dot_dimension_numbers<[1], [0], [0], [1], [0, 0, 1, 1], [], []>} : vector<8x128xbf16>, vector<128x128xbf16>, vector<8x128xf32> -> vector<8x128xf32>
    %29 = vector.broadcast %26 : vector<1x128xf32> to vector<8x128xf32>
    %30 = arith.addf %28, %29 : vector<8x128xf32>
    %cst_23 = arith.constant 0.000000e+00 : f32
    %31 = vector.broadcast %cst_23 : f32 to vector<8x128xf32>
    %32 = arith.maximumf %30, %31 : vector<8x128xf32>
    %c0_24 = arith.constant 0 : index
    %c0_25 = arith.constant 0 : index
    %33 = vector.load %arg6[%c0_24, %c0_25] : memref<128x128xbf16, #tpu.memory_space<vmem>>, vector<128x128xbf16>
    %c0_26 = arith.constant 0 : index
    %c0_27 = arith.constant 0 : index
    %34 = vector.load %arg16[%c0_26, %c0_27] : memref<1x128xf32, #tpu.memory_space<vmem>>, vector<1x128xf32>
    %35 = arith.truncf %32 : vector<8x128xf32> to vector<8x128xbf16>
    %cst_28 = arith.constant dense<0.000000e+00> : vector<8x128xf32>
    %36 = tpu.matmul %35, %33, %cst_28 {dimension_numbers = #tpu.dot_dimension_numbers<[1], [0], [0], [1], [0, 0, 1, 1], [], []>} : vector<8x128xbf16>, vector<128x128xbf16>, vector<8x128xf32> -> vector<8x128xf32>
    %37 = vector.broadcast %34 : vector<1x128xf32> to vector<8x128xf32>
    %38 = arith.addf %36, %37 : vector<8x128xf32>
    %c0_29 = arith.constant 0 : index
    %c0_30 = arith.constant 0 : index
    %39 = vector.load %arg22[%c0_29, %c0_30] : memref<8x128xf32, #tpu.memory_space<vmem>>, vector<8x128xf32>
    tpu.vector_store %arg22[%c0_29, %c0_30], %38 {strides = array<i32>} : memref<8x128xf32, #tpu.memory_space<vmem>>, vector<8x128xf32>,
    %c0_31 = arith.constant 0 : index
    %c0_32 = arith.constant 0 : index
    %40 = vector.load %arg7[%c0_31, %c0_32] : memref<128x128xbf16, #tpu.memory_space<vmem>>, vector<128x128xbf16>
    %c0_33 = arith.constant 0 : index
    %c0_34 = arith.constant 0 : index
    %41 = vector.load %arg17[%c0_33, %c0_34] : memref<1x128xf32, #tpu.memory_space<vmem>>, vector<1x128xf32>
    %42 = arith.truncf %38 : vector<8x128xf32> to vector<8x128xbf16>
    %cst_35 = arith.constant dense<0.000000e+00> : vector<8x128xf32>
    %43 = tpu.matmul %42, %40, %cst_35 {dimension_numbers = #tpu.dot_dimension_numbers<[1], [0], [0], [1], [0, 0, 1, 1], [], []>} : vector<8x128xbf16>, vector<128x128xbf16>, vector<8x128xf32> -> vector<8x128xf32>
    %44 = vector.broadcast %41 : vector<1x128xf32> to vector<8x128xf32>
    %45 = arith.addf %43, %44 : vector<8x128xf32>
    %cst_36 = arith.constant 0.000000e+00 : f32
    %46 = vector.broadcast %cst_36 : f32 to vector<8x128xf32>
    %47 = arith.maximumf %45, %46 : vector<8x128xf32>
    %c0_37 = arith.constant 0 : index
    %c0_38 = arith.constant 0 : index
    %48 = vector.load %arg8[%c0_37, %c0_38] : memref<128x128xbf16, #tpu.memory_space<vmem>>, vector<128x128xbf16>
    %c0_39 = arith.constant 0 : index
    %c0_40 = arith.constant 0 : index
    %49 = vector.load %arg18[%c0_39, %c0_40] : memref<1x128xf32, #tpu.memory_space<vmem>>, vector<1x128xf32>
    %50 = arith.truncf %47 : vector<8x128xf32> to vector<8x128xbf16>
    %cst_41 = arith.constant dense<0.000000e+00> : vector<8x128xf32>
    %51 = tpu.matmul %50, %48, %cst_41 {dimension_numbers = #tpu.dot_dimension_numbers<[1], [0], [0], [1], [0, 0, 1, 1], [], []>} : vector<8x128xbf16>, vector<128x128xbf16>, vector<8x128xf32> -> vector<8x128xf32>
    %52 = vector.broadcast %49 : vector<1x128xf32> to vector<8x128xf32>
    %53 = arith.addf %51, %52 : vector<8x128xf32>
    %cst_42 = arith.constant 0.000000e+00 : f32
    %54 = vector.broadcast %cst_42 : f32 to vector<8x128xf32>
    %55 = arith.maximumf %53, %54 : vector<8x128xf32>
    %c0_43 = arith.constant 0 : index
    %c0_44 = arith.constant 0 : index
    %56 = vector.load %arg9[%c0_43, %c0_44] : memref<128x128xbf16, #tpu.memory_space<vmem>>, vector<128x128xbf16>
    %c0_45 = arith.constant 0 : index
    %c0_46 = arith.constant 0 : index
    %57 = vector.load %arg19[%c0_45, %c0_46] : memref<1x128xf32, #tpu.memory_space<vmem>>, vector<1x128xf32>
    %58 = arith.truncf %55 : vector<8x128xf32> to vector<8x128xbf16>
    %cst_47 = arith.constant dense<0.000000e+00> : vector<8x128xf32>
    %59 = tpu.matmul %58, %56, %cst_47 {dimension_numbers = #tpu.dot_dimension_numbers<[1], [0], [0], [1], [0, 0, 1, 1], [], []>} : vector<8x128xbf16>, vector<128x128xbf16>, vector<8x128xf32> -> vector<8x128xf32>
    %60 = vector.broadcast %57 : vector<1x128xf32> to vector<8x128xf32>
    %61 = arith.addf %59, %60 : vector<8x128xf32>
    %cst_48 = arith.constant 0.000000e+00 : f32
    %62 = vector.broadcast %cst_48 : f32 to vector<8x128xf32>
    %63 = arith.maximumf %61, %62 : vector<8x128xf32>
    %c0_49 = arith.constant 0 : index
    %c0_50 = arith.constant 0 : index
    %64 = vector.load %arg10[%c0_49, %c0_50] : memref<128x256xbf16, #tpu.memory_space<vmem>>, vector<128x256xbf16>
    %c0_51 = arith.constant 0 : index
    %c0_52 = arith.constant 0 : index
    %65 = vector.load %arg20[%c0_51, %c0_52] : memref<1x256xf32, #tpu.memory_space<vmem>>, vector<1x256xf32>
    %66 = arith.truncf %63 : vector<8x128xf32> to vector<8x128xbf16>
    %cst_53 = arith.constant dense<0.000000e+00> : vector<8x256xf32>
    %67 = tpu.matmul %66, %64, %cst_53 {dimension_numbers = #tpu.dot_dimension_numbers<[1], [0], [0], [1], [0, 0, 1, 1], [], []>} : vector<8x128xbf16>, vector<128x256xbf16>, vector<8x256xf32> -> vector<8x256xf32>
    %68 = vector.broadcast %65 : vector<1x256xf32> to vector<8x256xf32>
    %69 = arith.addf %67, %68 : vector<8x256xf32>
    %cst_54 = arith.constant 0.000000e+00 : f32
    %70 = vector.broadcast %cst_54 : f32 to vector<8x256xf32>
    %71 = arith.maximumf %69, %70 : vector<8x256xf32>
    %c0_55 = arith.constant 0 : index
    %c0_56 = arith.constant 0 : index
    %72 = vector.load %arg11[%c0_55, %c0_56] : memref<256x128xbf16, #tpu.memory_space<vmem>>, vector<256x128xbf16>
    %c0_57 = arith.constant 0 : index
    %c0_58 = arith.constant 0 : index
    %73 = vector.load %arg21[%c0_57, %c0_58] : memref<1x128xf32, #tpu.memory_space<vmem>>, vector<1x128xf32>
    %74 = arith.truncf %71 : vector<8x256xf32> to vector<8x256xbf16>
    %cst_59 = arith.constant dense<0.000000e+00> : vector<8x128xf32>
    %75 = tpu.matmul %74, %72, %cst_59 {dimension_numbers = #tpu.dot_dimension_numbers<[1], [0], [0], [1], [0, 0, 1, 1], [], []>} : vector<8x256xbf16>, vector<256x128xbf16>, vector<8x128xf32> -> vector<8x128xf32>
    %76 = vector.broadcast %73 : vector<1x128xf32> to vector<8x128xf32>
    %77 = arith.addf %75, %76 : vector<8x128xf32>
    %c0_60 = arith.constant 0 : index
    %c0_61 = arith.constant 0 : index
    %78 = vector.load %arg23[%c0_60, %c0_61] : memref<8x128xf32, #tpu.memory_space<vmem>>, vector<8x128xf32>
    tpu.vector_store %arg23[%c0_60, %c0_61], %77 {strides = array<i32>} : memref<8x128xf32, #tpu.memory_space<vmem>>, vector<8x128xf32>,
    return
  }
  func.func @transform_0(%arg0: i32) -> (i32, i32) {
    %c0_i32 = arith.constant 0 : i32
    %c0_i32_0 = arith.constant 0 : i32
    return %arg0, %c0_i32 : i32, i32
  }
  func.func @transform_1(%arg0: i32) -> (i32, i32) {
    %c0_i32 = arith.constant 0 : i32
    %c0_i32_0 = arith.constant 0 : i32
    %c0_i32_1 = arith.constant 0 : i32
    return %c0_i32, %c0_i32_0 : i32, i32
  }
  func.func @transform_2(%arg0: i32) -> (i32, i32) {
    %c0_i32 = arith.constant 0 : i32
    %c0_i32_0 = arith.constant 0 : i32
    %c0_i32_1 = arith.constant 0 : i32
    return %c0_i32, %c0_i32_0 : i32, i32
  }
  func.func @transform_3(%arg0: i32) -> (i32, i32) {
    %c0_i32 = arith.constant 0 : i32
    %c0_i32_0 = arith.constant 0 : i32
    %c0_i32_1 = arith.constant 0 : i32
    return %c0_i32, %c0_i32_0 : i32, i32
  }
  func.func @transform_4(%arg0: i32) -> (i32, i32) {
    %c0_i32 = arith.constant 0 : i32
    %c0_i32_0 = arith.constant 0 : i32
    %c0_i32_1 = arith.constant 0 : i32
    return %c0_i32, %c0_i32_0 : i32, i32
  }
  func.func @transform_5(%arg0: i32) -> (i32, i32) {
    %c0_i32 = arith.constant 0 : i32
    %c0_i32_0 = arith.constant 0 : i32
    %c0_i32_1 = arith.constant 0 : i32
    return %c0_i32, %c0_i32_0 : i32, i32
  }
  func.func @transform_6(%arg0: i32) -> (i32, i32) {
    %c0_i32 = arith.constant 0 : i32
    %c0_i32_0 = arith.constant 0 : i32
    %c0_i32_1 = arith.constant 0 : i32
    return %c0_i32, %c0_i32_0 : i32, i32
  }
  func.func @transform_7(%arg0: i32) -> (i32, i32) {
    %c0_i32 = arith.constant 0 : i32
    %c0_i32_0 = arith.constant 0 : i32
    %c0_i32_1 = arith.constant 0 : i32
    return %c0_i32, %c0_i32_0 : i32, i32
  }
  func.func @transform_8(%arg0: i32) -> (i32, i32) {
    %c0_i32 = arith.constant 0 : i32
    %c0_i32_0 = arith.constant 0 : i32
    %c0_i32_1 = arith.constant 0 : i32
    return %c0_i32, %c0_i32_0 : i32, i32
  }
  func.func @transform_9(%arg0: i32) -> (i32, i32) {
    %c0_i32 = arith.constant 0 : i32
    %c0_i32_0 = arith.constant 0 : i32
    %c0_i32_1 = arith.constant 0 : i32
    return %c0_i32, %c0_i32_0 : i32, i32
  }
  func.func @transform_10(%arg0: i32) -> (i32, i32) {
    %c0_i32 = arith.constant 0 : i32
    %c0_i32_0 = arith.constant 0 : i32
    %c0_i32_1 = arith.constant 0 : i32
    return %c0_i32, %c0_i32_0 : i32, i32
  }
  func.func @transform_11(%arg0: i32) -> (i32, i32) {
    %c0_i32 = arith.constant 0 : i32
    %c0_i32_0 = arith.constant 0 : i32
    %c0_i32_1 = arith.constant 0 : i32
    return %c0_i32, %c0_i32_0 : i32, i32
  }
  func.func @transform_12(%arg0: i32) -> (i32, i32) {
    %c0_i32 = arith.constant 0 : i32
    %c0_i32_0 = arith.constant 0 : i32
    %c0_i32_1 = arith.constant 0 : i32
    return %c0_i32, %c0_i32_0 : i32, i32
  }
  func.func @transform_13(%arg0: i32) -> (i32, i32) {
    %c0_i32 = arith.constant 0 : i32
    %c0_i32_0 = arith.constant 0 : i32
    %c0_i32_1 = arith.constant 0 : i32
    return %c0_i32, %c0_i32_0 : i32, i32
  }
  func.func @transform_14(%arg0: i32) -> (i32, i32) {
    %c0_i32 = arith.constant 0 : i32
    %c0_i32_0 = arith.constant 0 : i32
    %c0_i32_1 = arith.constant 0 : i32
    return %c0_i32, %c0_i32_0 : i32, i32
  }
  func.func @transform_15(%arg0: i32) -> (i32, i32) {
    %c0_i32 = arith.constant 0 : i32
    %c0_i32_0 = arith.constant 0 : i32
    %c0_i32_1 = arith.constant 0 : i32
    return %c0_i32, %c0_i32_0 : i32, i32
  }
  func.func @transform_16(%arg0: i32) -> (i32, i32) {
    %c0_i32 = arith.constant 0 : i32
    %c0_i32_0 = arith.constant 0 : i32
    %c0_i32_1 = arith.constant 0 : i32
    return %c0_i32, %c0_i32_0 : i32, i32
  }
  func.func @transform_17(%arg0: i32) -> (i32, i32) {
    %c0_i32 = arith.constant 0 : i32
    %c0_i32_0 = arith.constant 0 : i32
    %c0_i32_1 = arith.constant 0 : i32
    return %c0_i32, %c0_i32_0 : i32, i32
  }
  func.func @transform_18(%arg0: i32) -> (i32, i32) {
    %c0_i32 = arith.constant 0 : i32
    %c0_i32_0 = arith.constant 0 : i32
    %c0_i32_1 = arith.constant 0 : i32
    return %c0_i32, %c0_i32_0 : i32, i32
  }
  func.func @transform_19(%arg0: i32) -> (i32, i32) {
    %c0_i32 = arith.constant 0 : i32
    %c0_i32_0 = arith.constant 0 : i32
    %c0_i32_1 = arith.constant 0 : i32
    return %c0_i32, %c0_i32_0 : i32, i32
  }
  func.func @transform_20(%arg0: i32) -> (i32, i32) {
    %c0_i32 = arith.constant 0 : i32
    %c0_i32_0 = arith.constant 0 : i32
    %c0_i32_1 = arith.constant 0 : i32
    return %c0_i32, %c0_i32_0 : i32, i32
  }
  func.func @transform_21(%arg0: i32) -> (i32, i32) {
    %c0_i32 = arith.constant 0 : i32
    %c0_i32_0 = arith.constant 0 : i32
    return %arg0, %c0_i32 : i32, i32
  }
  func.func @transform_22(%arg0: i32) -> (i32, i32) {
    %c0_i32 = arith.constant 0 : i32
    %c0_i32_0 = arith.constant 0 : i32
    return %arg0, %c0_i32 : i32, i32
  }
}

</mosaic_0001>

<bundles_post_ra>
// kernel: autoencoder_forward.1
= control target key start
LH: loop header
LB: loop body
LE: loop exit
PB: predicated region body
PF: predicated region fallthrough
CT: control target
= control target key end

     0   :  { %s2344_s0 = inlined_call_operand.vmem [shape: f32[8,16], index: 0, kind: input, shape index: {}]   ;;  %s2345_s1 = inlined_call_operand.vmem [shape: bf16[16,256], index: 1, kind: input, shape index: {}]   ;;  %s2346_s2 = inlined_call_operand.vmem [shape: bf16[256,128], index: 2, kind: input, shape index: {}]   ;;  %s2347_s3 = inlined_call_operand.vmem [shape: bf16[128,128], index: 3, kind: input, shape index: {}]   ;;  %s2348_s4 = inlined_call_operand.vmem [shape: bf16[128,128], index: 4, kind: input, shape index: {}]   ;;  %s2349_s5 = inlined_call_operand.vmem [shape: bf16[128,128], index: 5, kind: input, shape index: {}]   ;;  %s2350_s6 = inlined_call_operand.vmem [shape: bf16[128,128], index: 6, kind: input, shape index: {}]   ;;  %s2351_s7 = inlined_call_operand.vmem [shape: bf16[128,128], index: 7, kind: input, shape index: {}]   ;;  %s2352_s8 = inlined_call_operand.vmem [shape: bf16[128,128], index: 8, kind: input, shape index: {}]   ;;  %s2353_s9 = inlined_call_operand.vmem [shape: bf16[128,256], index: 9, kind: input, shape index: {}]   ;;  %s2354_s10 = inlined_call_operand.vmem [shape: bf16[256,128], index: 10, kind: input, shape index: {}]   ;;  %s2355_s11 = inlined_call_operand.vmem [shape: f32[1,256], index: 11, kind: input, shape index: {}]   ;;  %s2356_s12 = inlined_call_operand.vmem [shape: f32[1,128], index: 12, kind: input, shape index: {}]   ;;  %s2357_s13 = inlined_call_operand.vmem [shape: f32[1,128], index: 13, kind: input, shape index: {}]   ;;  %s2358_s14 = inlined_call_operand.vmem [shape: f32[1,128], index: 14, kind: input, shape index: {}]   ;;  %s2359_s15 = inlined_call_operand.vmem [shape: f32[1,128], index: 15, kind: input, shape index: {}]   ;;  %s2360_s16 = inlined_call_operand.vmem [shape: f32[1,128], index: 16, kind: input, shape index: {}]   ;;  %s2361_s17 = inlined_call_operand.vmem [shape: f32[1,128], index: 17, kind: input, shape index: {}]   ;;  %s2362_s18 = inlined_call_operand.vmem [shape: f32[1,128], index: 18, kind: input, shape index: {}]   ;;  %s2363_s19 = inlined_call_operand.vmem [shape: f32[1,256], index: 19, kind: input, shape index: {}]   ;;  %s2364_s20 = inlined_call_operand.vmem [shape: f32[1,128], index: 20, kind: input, shape index: {}]   ;;  %s2365_s21 = inlined_call_operand.vmem [shape: f32[8,128], index: 21, kind: output, shape index: {0}]   ;;  %s2366_s22 = inlined_call_operand.hbm [shape: f32[8,128], index: 22, kind: output, shape index: {1}]  }
   0x1   :  { %2373 = sst [smem:[#allocation5_spill]] %s2344_s0 }
   0x2   :  { %2374 = sst [smem:[#allocation6_spill]] %s2345_s1 }
   0x3   :  { %2375 = sst [smem:[#allocation7_spill]] %s2346_s2 }
   0x4   :  { %2376 = sst [smem:[#allocation8_spill]] %s2347_s3 }
   0x5   :  { %2377 = sst [smem:[#allocation9_spill]] %s2348_s4 }
   0x6   :  { %2378 = sst [smem:[#allocation10_spill]] %s2349_s5 }
   0x7   :  { %2379 = sst [smem:[#allocation11_spill]] %s2350_s6 }
   0x8   :  { %s2380_s29 = sld [smem:[#allocation6_spill]]  ;;  %v1809_v2 = vmov 0   ;;  %s2381_s1 = sld [smem:[#allocation5_spill]]  ;;  %vm98_vm0 = vcmask 130048  }
   0x9   :  { %134 = vmatprep.mubr.bf16.mxu0 %v1809_v2  ;;  %s2382_s6 = sld [smem:[#allocation7_spill]] }
   0xe   :  { %v1678_v0 = vld [vmem:[%s2380_s29 + $0x4] ss:$8 sps:$4 sm:$0xff]   ;;  %v1680_v1 = vld [vmem:[%s2380_s29] ss:$8 sps:$4 sm:$0xff]  }
   0xf   :  { %v72_v3 = vld [vmem:[%s2381_s1] sm:$0xff]  ;;  %102 = vmatprep.subr.bf16.mxu0 %v1678_v0  ;;  %v1683_v7 = vld [vmem:[%s2382_s6 + $0x48] sm:$0xff]   ;;  %v1685_v9 = vld [vmem:[%s2382_s6 + $0x50] sm:$0xff]  }
  0x10   :  { %v76_v4 = vpack.c.bf16 %v72_v3, %v72_v3  ;;  %v1681_v5 = vld [vmem:[%s2382_s6 + $0x40] sm:$0xff]   ;;  %103 = vmatpush1.bf16.msra.mxu0 %v1680_v1  ;;  %v1684_v8 = vld [vmem:[%s2382_s6 + $0x8] sm:$0xff]   ;;  %v1686_v10 = vld [vmem:[%s2382_s6 + $0x10] sm:$0xff]  }
  0x11   :  { %v1682_v6 = vld [vmem:[%s2382_s6] sm:$0xff]   ;;  %1456 = vmatprep.subr.bf16.mxu1 %v1681_v5  ;;  %v1687_v11 = vld [vmem:[%s2382_s6 + $0x58] sm:$0xff]   ;;  %v1691_v15 = vld [vmem:[%s2382_s6 + $0x68] sm:$0xff]  }
  0x12   :  { %1457 = vmatpush3.bf16.msra.mxu1 %v1682_v6  ;;  %v1688_v12 = vld [vmem:[%s2382_s6 + $0x18] sm:$0xff]   ;;  %v1689_v13 = vld [vmem:[%s2382_s6 + $0x60] sm:$0xff]   ;;  %v1692_v16 = vld [vmem:[%s2382_s6 + $0x28] sm:$0xff]  }
  0x13   :  { %1351 = vmatmul.mubr.msk.bf16.vlgmr.msra.gmra.mrb[0].mxu0 %vm98_vm0, %v76_v4  ;;  %1458 = vmatprep.subr.bf16.mxu1 %v1683_v7  ;;  %v1690_v14 = vld [vmem:[%s2382_s6 + $0x20] sm:$0xff]  }
  0x16   :  { %1459 = vmatpush3.bf16.msra.mxu1 %v1684_v8 }
  0x17   :  { %1460 = vmatprep.subr.bf16.mxu1 %v1685_v9 }
  0x1a   :  { %1461 = vmatpush3.bf16.msra.mxu1 %v1686_v10 }
  0x1b   :  { %1462 = vmatprep.subr.bf16.mxu1 %v1687_v11 }
  0x1e   :  { %1463 = vmatpush3.bf16.msra.mxu1 %v1688_v12 }
  0x1f   :  { %1464 = vmatprep.subr.bf16.mxu1 %v1689_v13 }
  0x22   :  { %1465 = vmatpush3.bf16.msra.mxu1 %v1690_v14 }
  0x23   :  { %1466 = vmatprep.subr.bf16.mxu1 %v1691_v15 }
  0x26   :  { %1467 = vmatpush3.bf16.msra.mxu1 %v1692_v16 }
  0x27   :  { %28 = vsyncpa [#allocation3], 0  ;;  %v1693_v17 = vld [vmem:[%s2382_s6 + $0x70] sm:$0xff]   ;;  %v1695_v19 = vld [vmem:[%s2382_s6 + $0x78] sm:$0xff]   ;;  %s2383_s3 = sld [smem:[#allocation8_spill]]  ;;  %v1810_v22 = vmov 0.0   ;;  %v78_v28 = vlaneseq }
  0x28   :  { %v1694_v18 = vld [vmem:[%s2382_s6 + $0x30] sm:$0xff]   ;;  %1468 = vmatprep.subr.bf16.mxu1 %v1693_v17  ;;  %v1696_v20 = vld [vmem:[%s2382_s6 + $0x38] sm:$0xff]   ;;  %1554 = vmatprep.subr.bf16.mxu0 %v1810_v22  ;;  %v75_v31 = vld [vmem:[%s2355_s11] sm:$0x3]  ;;  %vm1811_vm1 = vmmov 0   ;;  %s2384_s30 = sld [smem:[#allocation9_spill]] }
  0x29   :  { %v2012_v29 = vshrl.u32 %v78_v28, 7  ;;  %1570 = vmatprep.mubr.msk.bf16.mxu0 %vm1811_vm1, %v1810_v22  ;;  %v1352_v54 = vld [vmem:[%s2356_s12] ss:$0 sm:$0xff]  ;;  %s2386_s1 = sld [smem:[#allocation11_spill]]  ;;  %s1812_s11 = smov [#allocation2]  }
  0x2a   :  { %1469 = vmatpush3.bf16.msra.mxu1 %v1694_v18  ;;  %v1369_v7 = vld [vmem:[%s2357_s13] ss:$0 sm:$0xff]  ;;  %s1339_s2 = sshll.u32 %s1812_s11, 4  ;;  %s1340_s2 = int_to_ptr.vmem [resolvable:$true] %s1339_s2 }
  0x2b   :  { %1470 = vmatprep.subr.bf16.mxu1 %v1695_v19  ;;  %v80_v30 = vsub.s32 0, %v2012_v29  ;;  %v84_v32 = vsub.s32 1, %v2012_v29  ;;  %s1785_s27 = scalar_lea.vmem %s1340_s2, 128  ;;  %p1790_p1 = scmp.lt.s32.totalorder %s1340_s2, %s1340_s2 }
  0x2c   :  { %p1786_p0 = scmp.ne.s32.totalorder %s1340_s2, %s1785_s27  ;;  %p1791_p2 = scmp.lt.s32.totalorder %s1785_s27, %s1785_s27 }
  0x2d   :  { %v1697_v21 = vld [vmem:[%s2383_s3] sm:$0xff]   ;;  %v1698_v23 = vld [vmem:[%s2383_s3 + $0x8] sm:$0xff]   ;;  %v1699_v24 = vld [vmem:[%s2383_s3 + $0x10] sm:$0xff]   ;;  %v81_v33 = vrot.slane %v75_v31, %v80_v30  ;;  %v85_v34 = vrot.slane %v75_v31, %v84_v32 }
  0x2e   :  { %1471 = vmatpush3.bf16.msra.mxu1 %v1696_v20  ;;  %1555 = vmatpush3.bf16.msra.mxu0 %v1697_v21  ;;  %v1700_v25 = vld [vmem:[%s2383_s3 + $0x18] sm:$0xff]   ;;  %v1701_v26 = vld [vmem:[%s2383_s3 + $0x20] sm:$0xff]   ;;  %v1702_v27 = vld [vmem:[%s2383_s3 + $0x28] sm:$0xff]   ;;  %p1792_p3 = por %p1791_p2, %p1790_p1 }
  0x2f   :  { %1574 = vmatprep.subr.bf16.mxu1 %v1810_v22  ;;  %1556 = vmatprep.subr.bf16.mxu0 %v1810_v22  ;;  %v1703_v45 = vld [vmem:[%s2383_s3 + $0x30] sm:$0xff]   ;;  %v1704_v46 = vld [vmem:[%s2383_s3 + $0x38] sm:$0xff]   ;;  %v1705_v47 = vld [vmem:[%s2384_s30] sm:$0xff]   ;;  %s2385_s3 = sld [smem:[#allocation10_spill]] }
  0x30   :  { %v1706_v48 = vld [vmem:[%s2384_s30 + $0x8] sm:$0xff]   ;;  %v1707_v49 = vld [vmem:[%s2384_s30 + $0x10] sm:$0xff]   ;;  %v1708_v50 = vld [vmem:[%s2384_s30 + $0x18] sm:$0xff]   ;;  %p1793_p4 = pnand %p1792_p3, %p1786_p0 }
  0x31   :  { %v1709_v51 = vld [vmem:[%s2384_s30 + $0x20] sm:$0xff]   ;;  %v1710_v52 = vld [vmem:[%s2384_s30 + $0x28] sm:$0xff]   ;;  %v1711_v62 = vld [vmem:[%s2384_s30 + $0x30] sm:$0xff]  }
  0x32   :  { %1557 = vmatpush3.bf16.msra.mxu0 %v1698_v23  ;;  %v1712_v63 = vld [vmem:[%s2384_s30 + $0x38] sm:$0xff]   ;;  %v1721_v17 = vld [vmem:[%s2386_s1] sm:$0xff]   ;;  %v1722_v18 = vld [vmem:[%s2386_s1 + $0x8] sm:$0xff]  }
  0x33   :  { %1558 = vmatprep.subr.bf16.mxu0 %v1810_v22  ;;  %v1723_v19 = vld [vmem:[%s2386_s1 + $0x10] sm:$0xff]   ;;  %v1724_v20 = vld [vmem:[%s2386_s1 + $0x18] sm:$0xff]   ;;  %v1725_v21 = vld [vmem:[%s2386_s1 + $0x20] sm:$0xff]  }
  0x34   :  { %v1726_v23 = vld [vmem:[%s2386_s1 + $0x28] sm:$0xff]  }
  0x35   :  { %v1713_v0 = vld [vmem:[%s2385_s3] sm:$0xff]   ;;  %v1714_v1 = vld [vmem:[%s2385_s3 + $0x8] sm:$0xff]   ;;  %v1715_v3 = vld [vmem:[%s2385_s3 + $0x10] sm:$0xff]  }
  0x36   :  { %1559 = vmatpush3.bf16.msra.mxu0 %v1699_v24  ;;  %v1716_v4 = vld [vmem:[%s2385_s3 + $0x18] sm:$0xff]   ;;  %v1717_v5 = vld [vmem:[%s2385_s3 + $0x20] sm:$0xff]   ;;  %v1718_v6 = vld [vmem:[%s2385_s3 + $0x28] sm:$0xff]  }
  0x37   :  { %1560 = vmatprep.subr.bf16.mxu0 %v1810_v22  ;;  %v1719_v15 = vld [vmem:[%s2385_s3 + $0x30] sm:$0xff]   ;;  %v1720_v16 = vld [vmem:[%s2385_s3 + $0x38] sm:$0xff]  }
  0x38   :  { %v1727_v24 = vld [vmem:[%s2386_s1 + $0x30] sm:$0xff]  }
  0x3a   :  { %1561 = vmatpush3.bf16.msra.mxu0 %v1700_v25  ;;  %v1378_v25 = vld [vmem:[%s2358_s14] ss:$0 sm:$0xff] }
  0x3b   :  { %1562 = vmatprep.subr.bf16.mxu0 %v1810_v22 }
  0x3e   :  { %1563 = vmatpush3.bf16.msra.mxu0 %v1701_v26 }
  0x3f   :  { %1564 = vmatprep.subr.bf16.mxu0 %v1810_v22 }
  0x42   :  { %1565 = vmatpush3.bf16.msra.mxu0 %v1702_v27 }
  0x43   :  { %1566 = vmatprep.subr.bf16.mxu0 %v1810_v22 }
  0x46   :  { %1567 = vmatpush3.bf16.msra.mxu0 %v1703_v45 }
  0x47   :  { %1568 = vmatprep.subr.bf16.mxu0 %v1810_v22 }
  0x4a   :  { %1569 = vmatpush3.bf16.msra.mxu0 %v1704_v46 }
  0x4b   :  { %1594 = vmatprep.subr.bf16.mxu0 %v1810_v22 }
  0xe6   :  { %v136_v35 = vpop.f32.mrb[0].mxu0 }
  0xe7   :  { %v137_v36 = vadd.f32 %v136_v35, %v81_v33  ;;  %v138_v37 = vpop.f32.mrb[1].mxu0 }
  0xe8   :  { %v139_v38 = vadd.f32 %v138_v37, %v85_v34  ;;  %v140_v39 = vpop.f32.mrb[2].mxu0  ;;  %v1729_v37 = vld [vmem:[%s2351_s7] sm:$0xff]  }
  0xe9   :  { %v143_v40 = vmax.f32 %v137_v36, 0.0  ;;  %v141_v41 = vpop.f32.mrb[3].mxu0  ;;  %v1728_v36 = vld [vmem:[%s2386_s1 + $0x38] sm:$0xff]   ;;  %v1731_v39 = vld [vmem:[%s2351_s7 + $0x10] sm:$0xff]  }
  0xea   :  { %v144_v42 = vmax.f32 %v139_v38, 0.0  ;;  %v1730_v38 = vld [vmem:[%s2351_s7 + $0x8] sm:$0xff]   ;;  %v1733_v41 = vld [vmem:[%s2351_s7 + $0x20] sm:$0xff]  }
  0xeb   :  { %v178_v44 = vpack.c.bf16 %v143_v40, %v143_v40  ;;  %v1732_v40 = vld [vmem:[%s2351_s7 + $0x18] sm:$0xff]  }
  0xec   :  { %v179_v43 = vpack.c.bf16 %v144_v42, %v144_v42  ;;  %v1734_v42 = vld [vmem:[%s2351_s7 + $0x28] sm:$0xff]  }
  0xee   :  { %314 = vmatprep.mubr.bf16.mxu1 %v179_v43  ;;  %v1387_v43 = vld [vmem:[%s2359_s15] ss:$0 sm:$0xff] }
  0xef   :  { %315 = vmatmul.mubr.bf16.vlgmr.msra.gmra.mrb[0].mxu1 %v178_v44 }
  0xf0   :  { %1590 = vmatprep.mubr.msk.bf16.mxu1 %vm1811_vm1, %v1810_v22  ;;  %1575 = vmatpush3.bf16.msra.mxu1 %v1705_v47 }
  0xf1   :  { %1576 = vmatprep.subr.bf16.mxu1 %v1810_v22 }
  0xf4   :  { %1577 = vmatpush3.bf16.msra.mxu1 %v1706_v48 }
  0xf5   :  { %1578 = vmatprep.subr.bf16.mxu1 %v1810_v22 }
  0xf8   :  { %1579 = vmatpush3.bf16.msra.mxu1 %v1707_v49 }
  0xf9   :  { %1580 = vmatprep.subr.bf16.mxu1 %v1810_v22 }
  0xfc   :  { %1581 = vmatpush3.bf16.msra.mxu1 %v1708_v50  ;;  %v1735_v50 = vld [vmem:[%s2351_s7 + $0x30] sm:$0xff]  }
  0xfd   :  { %1582 = vmatprep.subr.bf16.mxu1 %v1810_v22 }
 0x100   :  { %1583 = vmatpush3.bf16.msra.mxu1 %v1709_v51  ;;  %v1736_v51 = vld [vmem:[%s2351_s7 + $0x38] sm:$0xff]  }
 0x101   :  { %1584 = vmatprep.subr.bf16.mxu1 %v1810_v22 }
 0x104   :  { %1585 = vmatpush3.bf16.msra.mxu1 %v1710_v52  ;;  %v1737_v52 = vld [vmem:[%s2352_s8] sm:$0xff]  }
 0x105   :  { %1586 = vmatprep.subr.bf16.mxu1 %v1810_v22 }
 0x108   :  { %1587 = vmatpush3.bf16.msra.mxu1 %v1711_v62 }
 0x109   :  { %1588 = vmatprep.subr.bf16.mxu1 %v1810_v22 }
 0x10c   :  { %1589 = vmatpush3.bf16.msra.mxu1 %v1712_v63 }
 0x10d   :  { %1614 = vmatprep.subr.bf16.mxu1 %v1810_v22 }
 0x1c2   :  { %v1472_v53 = vpop.f32.mrb[0].mxu1 }
 0x1c3   :  { %v1473_v55 = vpop.f32.mrb[1].mxu1 }
 0x1c4   :  { %v1474_v56 = vadd.f32 %v1473_v55, %v1472_v53  ;;  %v1475_v57 = vpop.f32.mrb[2].mxu1  ;;  %v1738_v53 = vld [vmem:[%s2352_s8 + $0x8] sm:$0xff]   ;;  %v1740_v55 = vld [vmem:[%s2352_s8 + $0x18] sm:$0xff]  }
 0x1c5   :  { %v1476_v58 = vpop.f32.mrb[3].mxu1  ;;  %v1742_v57 = vld [vmem:[%s2352_s8 + $0x28] sm:$0xff]  }
 0x1c6   :  { %v317_v59 = vadd.f32 %v1474_v56, %v1352_v54  ;;  %v1739_v54 = vld [vmem:[%s2352_s8 + $0x10] sm:$0xff]   ;;  %v1741_v56 = vld [vmem:[%s2352_s8 + $0x20] sm:$0xff]  }
 0x1c7   :  { %v1396_v58 = vld [vmem:[%s2360_s16] ss:$0 sm:$0xff] }
 0x1c8   :  { %v322_v60 = vmax.f32 %v317_v59, 0.0 }
 0x1ca   :  { %v340_v61 = vpack.c.bf16 %v322_v60, %v322_v60 }
 0x1cc   :  { %1571 = vmatmul.mubr.bf16.vlgmr.msra.gmra.mrb[4].mxu0 %v340_v61 }
 0x1cd   :  { %1610 = vmatprep.mubr.msk.bf16.mxu0 %vm1811_vm1, %v1810_v22  ;;  %1595 = vmatpush3.bf16.msra.mxu0 %v1713_v0 }
 0x1ce   :  { %1596 = vmatprep.subr.bf16.mxu0 %v1810_v22 }
 0x1d1   :  { %1597 = vmatpush3.bf16.msra.mxu0 %v1714_v1 }
 0x1d2   :  { %1598 = vmatprep.subr.bf16.mxu0 %v1810_v22 }
 0x1d5   :  { %1599 = vmatpush3.bf16.msra.mxu0 %v1715_v3  ;;  %v1743_v3 = vld [vmem:[%s2352_s8 + $0x30] sm:$0xff]  }
 0x1d6   :  { %1600 = vmatprep.subr.bf16.mxu0 %v1810_v22 }
 0x1d9   :  { %1601 = vmatpush3.bf16.msra.mxu0 %v1716_v4  ;;  %v1744_v4 = vld [vmem:[%s2352_s8 + $0x38] sm:$0xff]  }
 0x1da   :  { %1602 = vmatprep.subr.bf16.mxu0 %v1810_v22 }
 0x1dd   :  { %1603 = vmatpush3.bf16.msra.mxu0 %v1717_v5  ;;  %v1745_v5 = vld [vmem:[%s2353_s9] ss:$8 sps:$4 sm:$0xff]  }
 0x1de   :  { %1604 = vmatprep.subr.bf16.mxu0 %v1810_v22 }
 0x1e1   :  { %1605 = vmatpush3.bf16.msra.mxu0 %v1718_v6  ;;  %v1750_v6 = vld [vmem:[%s2353_s9 + $0x14] ss:$8 sps:$4 sm:$0xff]  }
 0x1e2   :  { %1606 = vmatprep.subr.bf16.mxu0 %v1810_v22 }
 0x1e5   :  { %1607 = vmatpush3.bf16.msra.mxu0 %v1719_v15  ;;  %v1765_v15 = vld [vmem:[%s2353_s9 + $0x64] ss:$8 sps:$4 sm:$0xff]  }
 0x1e6   :  { %1608 = vmatprep.subr.bf16.mxu0 %v1810_v22 }
 0x1e9   :  { %1609 = vmatpush3.bf16.msra.mxu0 %v1720_v16  ;;  %v1763_v16 = vld [vmem:[%s2353_s9 + $0x60] ss:$8 sps:$4 sm:$0xff]  }
 0x1ea   :  { %1634 = vmatprep.subr.bf16.mxu0 %v1810_v22 }
 0x29f   :  { %v429_v8 = vpop.f32.mrb[4].mxu0 }
 0x2a0   :  { %v430_v9 = vadd.f32 %v1369_v7, %v429_v8  ;;  %v1572_v10 = vpop.f32.mrb[5].mxu0  ;;  %v1753_v7 = vld [vmem:[%s2353_s9 + $0x24] ss:$8 sps:$4 sm:$0xff]   ;;  %v1751_v8 = vld [vmem:[%s2353_s9 + $0x20] ss:$8 sps:$4 sm:$0xff]  }
 0x2a1   :  { %v432_v11 = vpop.f32.mrb[6].mxu0  ;;  %v1754_v10 = vld [vmem:[%s2353_s9 + $0x30] ss:$8 sps:$4 sm:$0xff]  }
 0x2a2   :  { %v435_v12 = vmax.f32 %v430_v9, 0.0  ;;  %v1573_v13 = vpop.f32.mrb[7].mxu0  ;;  %v1756_v9 = vld [vmem:[%s2353_s9 + $0x34] ss:$8 sps:$4 sm:$0xff]   ;;  %v1759_v11 = vld [vmem:[%s2353_s9 + $0x44] ss:$8 sps:$4 sm:$0xff]  }
 0x2a3   :  { %v1762_v13 = vld [vmem:[%s2353_s9 + $0x54] ss:$8 sps:$4 sm:$0xff]  }
 0x2a4   :  { %v453_v14 = vpack.c.bf16 %v435_v12, %v435_v12  ;;  %v1757_v12 = vld [vmem:[%s2353_s9 + $0x40] ss:$8 sps:$4 sm:$0xff]  }
 0x2a6   :  { %1591 = vmatmul.mubr.bf16.vlgmr.msra.gmra.mrb[4].mxu1 %v453_v14  ;;  %v1760_v14 = vld [vmem:[%s2353_s9 + $0x50] ss:$8 sps:$4 sm:$0xff]  }
 0x2a7   :  { %1630 = vmatprep.mubr.msk.bf16.mxu1 %vm1811_vm1, %v1810_v22  ;;  %1615 = vmatpush3.bf16.msra.mxu1 %v1721_v17  ;;  %v1405_v17 = vld [vmem:[%s2361_s17] ss:$0 sm:$0xff] }
 0x2a8   :  { %1616 = vmatprep.subr.bf16.mxu1 %v1810_v22 }
 0x2ab   :  { %1617 = vmatpush3.bf16.msra.mxu1 %v1722_v18 }
 0x2ac   :  { %1618 = vmatprep.subr.bf16.mxu1 %v1810_v22 }
 0x2af   :  { %1619 = vmatpush3.bf16.msra.mxu1 %v1723_v19 }
 0x2b0   :  { %1620 = vmatprep.subr.bf16.mxu1 %v1810_v22 }
 0x2b3   :  { %1621 = vmatpush3.bf16.msra.mxu1 %v1724_v20 }
 0x2b4   :  { %1622 = vmatprep.subr.bf16.mxu1 %v1810_v22 }
 0x2b7   :  { %1623 = vmatpush3.bf16.msra.mxu1 %v1725_v21 }
 0x2b8   :  { %1624 = vmatprep.subr.bf16.mxu1 %v1810_v22 }
 0x2bb   :  { %1625 = vmatpush3.bf16.msra.mxu1 %v1726_v23 }
 0x2bc   :  { %1626 = vmatprep.subr.bf16.mxu1 %v1810_v22 }
 0x2bf   :  { %1627 = vmatpush3.bf16.msra.mxu1 %v1727_v24 }
 0x2c0   :  { %1628 = vmatprep.subr.bf16.mxu1 %v1810_v22 }
 0x2c3   :  { %1629 = vmatpush3.bf16.msra.mxu1 %v1728_v36  ;;  %v1774_v36 = vld [vmem:[%s2354_s10 + $0x10] sm:$0xff]  }
 0x2c4   :  { %1654 = vmatprep.subr.bf16.mxu1 %v1810_v22 }
 0x379   :  { %v542_v26 = vpop.f32.mrb[4].mxu1 }
 0x37a   :  { %v543_v27 = vadd.f32 %v1378_v25, %v542_v26  ;;  %v1592_v28 = vpop.f32.mrb[5].mxu1  ;;  %v1768_v26 = vld [vmem:[%s2353_s9 + $0x74] ss:$8 sps:$4 sm:$0xff]  }
 0x37b   :  { %v545_v31 = vpop.f32.mrb[6].mxu1  ;;  %v1769_v28 = vld [vmem:[%s2354_s10 + $0x40] sm:$0xff]  }
 0x37c   :  { %v548_v33 = vmax.f32 %v543_v27, 0.0  ;;  %v1593_v34 = vpop.f32.mrb[7].mxu1  ;;  %v1766_v27 = vld [vmem:[%s2353_s9 + $0x70] ss:$8 sps:$4 sm:$0xff]   ;;  %v1770_v31 = vld [vmem:[%s2354_s10] sm:$0xff]  }
 0x37d   :  { %v1772_v34 = vld [vmem:[%s2354_s10 + $0x8] sm:$0xff]  }
 0x37e   :  { %v566_v35 = vpack.c.bf16 %v548_v33, %v548_v33  ;;  %v1771_v33 = vld [vmem:[%s2354_s10 + $0x48] sm:$0xff]  }
 0x380   :  { %1611 = vmatmul.mubr.bf16.vlgmr.msra.gmra.mrb[8].mxu0 %v566_v35  ;;  %v1773_v35 = vld [vmem:[%s2354_s10 + $0x50] sm:$0xff]  }
 0x381   :  { %1650 = vmatprep.mubr.msk.bf16.mxu0 %vm1811_vm1, %v1810_v22  ;;  %1635 = vmatpush3.bf16.msra.mxu0 %v1729_v37  ;;  %v1775_v37 = vld [vmem:[%s2354_s10 + $0x58] sm:$0xff]  }
 0x382   :  { %1636 = vmatprep.subr.bf16.mxu0 %v1810_v22 }
 0x385   :  { %1637 = vmatpush3.bf16.msra.mxu0 %v1730_v38  ;;  %v1776_v38 = vld [vmem:[%s2354_s10 + $0x18] sm:$0xff]  }
 0x386   :  { %1638 = vmatprep.subr.bf16.mxu0 %v1810_v22 }
 0x389   :  { %1639 = vmatpush3.bf16.msra.mxu0 %v1731_v39  ;;  %v1777_v39 = vld [vmem:[%s2354_s10 + $0x60] sm:$0xff]  }
 0x38a   :  { %1640 = vmatprep.subr.bf16.mxu0 %v1810_v22 }
 0x38d   :  { %1641 = vmatpush3.bf16.msra.mxu0 %v1732_v40  ;;  %v1778_v40 = vld [vmem:[%s2354_s10 + $0x20] sm:$0xff]  }
 0x38e   :  { %1642 = vmatprep.subr.bf16.mxu0 %v1810_v22 }
 0x391   :  { %1643 = vmatpush3.bf16.msra.mxu0 %v1733_v41  ;;  %v1779_v41 = vld [vmem:[%s2354_s10 + $0x68] sm:$0xff]  }
 0x392   :  { %1644 = vmatprep.subr.bf16.mxu0 %v1810_v22 }
 0x395   :  { %1645 = vmatpush3.bf16.msra.mxu0 %v1734_v42  ;;  %v1780_v42 = vld [vmem:[%s2354_s10 + $0x28] sm:$0xff]  }
 0x396   :  { %1646 = vmatprep.subr.bf16.mxu0 %v1810_v22 }
 0x399   :  { %1647 = vmatpush3.bf16.msra.mxu0 %v1735_v50 }
 0x39a   :  { %1648 = vmatprep.subr.bf16.mxu0 %v1810_v22 }
 0x39d   :  { %1649 = vmatpush3.bf16.msra.mxu0 %v1736_v51  ;;  %v1781_v51 = vld [vmem:[%s2354_s10 + $0x70] sm:$0xff]  }
 0x453   :  { %v655_v44 = vpop.f32.mrb[8].mxu0 }
 0x454   :  { %v656_v45 = vadd.f32 %v1387_v43, %v655_v44  ;;  %v1612_v46 = vpop.f32.mrb[9].mxu0  ;;  %v1414_v43 = vld [vmem:[%s2362_s18] ss:$0 sm:$0xff] }
 0x455   :  { %v658_v47 = vpop.f32.mrb[10].mxu0 }
 0x456   :  { %661 = vst [vmem:[%s2365_s21] sm:$0xff] %v656_v45  ;;  %v679_v48 = vpack.c.bf16 %v656_v45, %v656_v45  ;;  %v1613_v49 = vpop.f32.mrb[11].mxu0 }
 0x458   :  { %1631 = vmatmul.mubr.bf16.vlgmr.msra.gmra.mrb[8].mxu1 %v679_v48 }
 0x459   :  { %1670 = vmatprep.mubr.msk.bf16.mxu1 %vm1811_vm1, %v1810_v22  ;;  %1655 = vmatpush3.bf16.msra.mxu1 %v1737_v52  ;;  %v1782_v52 = vld [vmem:[%s2354_s10 + $0x30] sm:$0xff]  }
 0x45a   :  { %1656 = vmatprep.subr.bf16.mxu1 %v1810_v22 }
 0x45d   :  { %1657 = vmatpush3.bf16.msra.mxu1 %v1738_v53  ;;  %v1783_v53 = vld [vmem:[%s2354_s10 + $0x78] sm:$0xff]  }
 0x45e   :  { %1658 = vmatprep.subr.bf16.mxu1 %v1810_v22 }
 0x461   :  { %1659 = vmatpush3.bf16.msra.mxu1 %v1739_v54  ;;  %v1784_v54 = vld [vmem:[%s2354_s10 + $0x38] sm:$0xff]  }
 0x462   :  { %1660 = vmatprep.subr.bf16.mxu1 %v1810_v22 }
 0x465   :  { %1661 = vmatpush3.bf16.msra.mxu1 %v1740_v55  ;;  %v1017_v55 = vld [vmem:[%s2363_s19] sm:$0x3] }
 0x466   :  { %1662 = vmatprep.subr.bf16.mxu1 %v1810_v22 }
 0x469   :  { %1663 = vmatpush3.bf16.msra.mxu1 %v1741_v56  ;;  %v1023_v56 = vrot.slane %v1017_v55, %v80_v30  ;;  %v1439_v30 = vld [vmem:[%s2364_s20] ss:$0 sm:$0xff] }
 0x46a   :  { %1664 = vmatprep.subr.bf16.mxu1 %v1810_v22 }
 0x46d   :  { %1665 = vmatpush3.bf16.msra.mxu1 %v1742_v57  ;;  %v1027_v57 = vrot.slane %v1017_v55, %v84_v32 }
 0x46e   :  { %1666 = vmatprep.subr.bf16.mxu1 %v1810_v22 }
 0x471   :  { %1667 = vmatpush3.bf16.msra.mxu1 %v1743_v3 }
 0x472   :  { %1668 = vmatprep.subr.bf16.mxu1 %v1810_v22  ;;  %v1748_v22 = vld [vmem:[%s2353_s9 + $0x10] ss:$8 sps:$4 sm:$0xff]  }
 0x475   :  { %1669 = vmatpush3.bf16.msra.mxu1 %v1744_v4 }
 0x476   :  { %1532 = vmatprep.subr.bf16.mxu1 %v1769_v28 }
 0x52b   :  { %v768_v59 = vpop.f32.mrb[8].mxu1 }
 0x52c   :  { %v769_v60 = vadd.f32 %v1396_v58, %v768_v59  ;;  %v1632_v61 = vpop.f32.mrb[9].mxu1 }
 0x52d   :  { %v771_v62 = vpop.f32.mrb[10].mxu1 }
 0x52e   :  { %v774_v63 = vmax.f32 %v769_v60, 0.0  ;;  %v1633_v0 = vpop.f32.mrb[11].mxu1 }
 0x530   :  { %v792_v1 = vpack.c.bf16 %v774_v63, %v774_v63 }
 0x532   :  { %1651 = vmatmul.mubr.bf16.vlgmr.msra.gmra.mrb[12].mxu0 %v792_v1 }
 0x533   :  { %1142 = vmatprep.mubr.bf16.mxu0 %v1809_v2  ;;  %v1747_v2 = vld [vmem:[%s2353_s9 + $0x4] ss:$8 sps:$4 sm:$0xff]  }
 0x534   :  { %1110 = vmatprep.subr.bf16.mxu0 %v1747_v2 }
 0x535   :  { %1111 = vmatpush1.bf16.msra.mxu0 %v1745_v5 }
 0x536   :  { %1112 = vmatprep.subr.bf16.mxu0 %v1750_v6 }
 0x539   :  { %1113 = vmatpush1.bf16.msra.mxu0 %v1748_v22 }
 0x53a   :  { %1114 = vmatprep.subr.bf16.mxu0 %v1753_v7 }
 0x53d   :  { %1115 = vmatpush1.bf16.msra.mxu0 %v1751_v8 }
 0x53e   :  { %1116 = vmatprep.subr.bf16.mxu0 %v1756_v9 }
 0x541   :  { %1117 = vmatpush1.bf16.msra.mxu0 %v1754_v10 }
 0x542   :  { %1118 = vmatprep.subr.bf16.mxu0 %v1759_v11 }
 0x545   :  { %1119 = vmatpush1.bf16.msra.mxu0 %v1757_v12 }
 0x546   :  { %1120 = vmatprep.subr.bf16.mxu0 %v1762_v13 }
 0x549   :  { %1121 = vmatpush1.bf16.msra.mxu0 %v1760_v14 }
 0x54a   :  { %1122 = vmatprep.subr.bf16.mxu0 %v1765_v15 }
 0x54d   :  { %1123 = vmatpush1.bf16.msra.mxu0 %v1763_v16 }
 0x54e   :  { %1124 = vmatprep.subr.bf16.mxu0 %v1768_v26 }
 0x551   :  { %1125 = vmatpush1.bf16.msra.mxu0 %v1766_v27 }
 0x605   :  { %v881_v18 = vpop.f32.mrb[12].mxu0 }
 0x606   :  { %v882_v19 = vadd.f32 %v1405_v17, %v881_v18  ;;  %v1652_v20 = vpop.f32.mrb[13].mxu0 }
 0x607   :  { %v884_v21 = vpop.f32.mrb[14].mxu0 }
 0x608   :  { %v887_v23 = vmax.f32 %v882_v19, 0.0  ;;  %v1653_v24 = vpop.f32.mrb[15].mxu0 }
 0x60a   :  { %v905_v25 = vpack.c.bf16 %v887_v23, %v887_v23 }
 0x60c   :  { %1671 = vmatmul.mubr.bf16.vlgmr.msra.gmra.mrb[12].mxu1 %v905_v25 }
 0x60d   :  { %1533 = vmatpush3.bf16.msra.mxu1 %v1770_v31 }
 0x60e   :  { %1534 = vmatprep.subr.bf16.mxu1 %v1771_v33 }
 0x611   :  { %1535 = vmatpush3.bf16.msra.mxu1 %v1772_v34 }
 0x612   :  { %1536 = vmatprep.subr.bf16.mxu1 %v1773_v35 }
 0x615   :  { %1537 = vmatpush3.bf16.msra.mxu1 %v1774_v36 }
 0x616   :  { %1538 = vmatprep.subr.bf16.mxu1 %v1775_v37 }
 0x619   :  { %1539 = vmatpush3.bf16.msra.mxu1 %v1776_v38 }
 0x61a   :  { %1540 = vmatprep.subr.bf16.mxu1 %v1777_v39 }
 0x61d   :  { %1541 = vmatpush3.bf16.msra.mxu1 %v1778_v40 }
 0x61e   :  { %1542 = vmatprep.subr.bf16.mxu1 %v1779_v41 }
 0x621   :  { %1543 = vmatpush3.bf16.msra.mxu1 %v1780_v42 }
 0x622   :  { %1544 = vmatprep.subr.bf16.mxu1 %v1781_v51 }
 0x625   :  { %1545 = vmatpush3.bf16.msra.mxu1 %v1782_v52 }
 0x626   :  { %1546 = vmatprep.subr.bf16.mxu1 %v1783_v53 }
 0x629   :  { %1547 = vmatpush3.bf16.msra.mxu1 %v1784_v54 }
 0x6df   :  { %v994_v44 = vpop.f32.mrb[12].mxu1 }
 0x6e0   :  { %v995_v45 = vadd.f32 %v1414_v43, %v994_v44  ;;  %v1672_v46 = vpop.f32.mrb[13].mxu1 }
 0x6e1   :  { %v997_v47 = vpop.f32.mrb[14].mxu1 }
 0x6e2   :  { %v1000_v48 = vmax.f32 %v995_v45, 0.0  ;;  %v1673_v49 = vpop.f32.mrb[15].mxu1 }
 0x6e4   :  { %v1018_v50 = vpack.c.bf16 %v1000_v48, %v1000_v48 }
 0x6e6   :  { %1143 = vmatmul.mubr.bf16.vlgmr.msra.gmra.mrb[16].mxu0 %v1018_v50 }
 0x7b9   :  { %v1144_v58 = vpop.f32.mrb[16].mxu0 }
 0x7ba   :  { %v1145_v59 = vadd.f32 %v1144_v58, %v1023_v56  ;;  %v1146_v60 = vpop.f32.mrb[17].mxu0 }
 0x7bb   :  { %v1147_v61 = vadd.f32 %v1146_v60, %v1027_v57  ;;  %v1148_v62 = vpop.f32.mrb[18].mxu0 }
 0x7bc   :  { %v1151_v63 = vmax.f32 %v1145_v59, 0.0  ;;  %v1149_v0 = vpop.f32.mrb[19].mxu0 }
 0x7bd   :  { %v1152_v1 = vmax.f32 %v1147_v61, 0.0 }
 0x7be   :  { %v1186_v4 = vpack.c.bf16 %v1151_v63, %v1151_v63 }
 0x7bf   :  { %v1187_v3 = vpack.c.bf16 %v1152_v1, %v1152_v1 }
 0x7c1   :  { %1322 = vmatprep.mubr.bf16.mxu1 %v1187_v3 }
 0x7c2   :  { %1323 = vmatmul.mubr.bf16.vlgmr.msra.gmra.mrb[16].mxu1 %v1186_v4 }
 0x895   :  { %v1548_v5 = vpop.f32.mrb[16].mxu1 }
 0x896   :  { %v1549_v2 = vpop.f32.mrb[17].mxu1 }
 0x897   :  { %v1550_v29 = vadd.f32 %v1549_v2, %v1548_v5  ;;  %v1551_v32 = vpop.f32.mrb[18].mxu1 }
 0x898   :  { %v1552_v6 = vpop.f32.mrb[19].mxu1 }
 0x899   :  { %v1325_v22 = vadd.f32 %v1550_v29, %v1439_v30 }
 0x89b   :  { %1330 = vst [vmem:[#allocation2] sm:$0xff] %v1325_v22 }
 0x89c   :  { %1796 = shalt.err (!%p1793_p4)
}
 0x89d   :  { %s1797_s6 = scalar_lea.hbm %s2366_s22, 128 }
 0x89e   :  { %p1798_p5 = scmp.ne.s32.totalorder %s2366_s22, %s1797_s6  ;;  %p1801_p6 = scmp.lt.u32.totalorder %s1797_s6, %s2366_s22 }
 0x8a0   :  { %p1803_p7 = pnand %p1801_p6, %p1798_p5 }
 0x8a2   :  { %1806 = shalt.err (!%p1803_p7)
}
 0x8a3   :  { %1342 = dma.vmem_to_hbm [thread:$0]  %s1340_s2, 128, %s2366_s22, [#allocation3]  }
 0x8a4   :  { %1807 = dma.done.wait [#allocation3], 128  }
 0x8a5   :  { %1808 = vsyncadd [#allocation3], 4294967168 }
 0x8a6   :  { %1348 = vsyncpa [#allocation3], 1 }

</bundles_post_ra>
